<compile_context>
chip_gen: v6e
topology: v6e:2x2x1
jax: 0.10.0
libtpu: 0.0.40
codegen_flags: <defaults>
</compile_context>

<pallas_src>
import functools

import jax
import jax.numpy as jnp
from jax.experimental import pallas as pl
from jax.experimental.pallas import tpu as pltpu

K_SIZE = 4
STRIDE = 2
PAD = 1
EPS = 1e-5  # nn.InstanceNorm2d default eps


def _round_up(x, m):
    return (x + m - 1) // m * m


def _make_phase_taps(x, cin_p, Ho, Wo):
    """x: (N, Cin, H, W) f32 -> (N, 8*cin_p, (Ho+1)*Wo) bf16 tap slab.

    Slot s = rp * 4 + kw (rp = kh % 2) occupies rows [s*cin_p, (s+1)*cin_p).
    Within a slot, flat spatial index r*Wo + w holds padded-input pixel
    (row = rp + 2*r, col = kw + 2*w), so tap (kh, kw) for output row r is the
    slot's lane window starting at (kh//2)*Wo.  Built entirely in bf16 so the
    glue stage moves half the HBM bytes of the f32 version.
    """
    N, Cin, H, W = x.shape
    xb = x.astype(jnp.bfloat16)
    xp = jnp.pad(xb, ((0, 0), (0, cin_p - Cin), (PAD, PAD), (PAD, PAD)))
    slots = []
    for rp in range(2):            # row parity of kh
        for kw in range(K_SIZE):   # column tap
            v = xp[:, :, rp::STRIDE, kw::STRIDE][:, :, : Ho + 1, :Wo]
            slots.append(v.reshape(N, cin_p, (Ho + 1) * Wo))
    return jnp.concatenate(slots, axis=1)  # (N, 8*cin_p, (Ho+1)*Wo) bf16


def _fuse_weights(weight, cout_p, cin_p, split_dh):
    """(Cout, Cin, 4, 4) f32 -> fused bf16 weights matching the slab row order.

    split_dh=True : (2, cout_p, 8*cin_p), columns ordered (rp, kw, cin).
    split_dh=False: (cout_p, 16*cin_p),   columns ordered (dh, rp, kw, cin).
    """
    Cout, Cin = weight.shape[:2]
    w = jnp.pad(weight, ((0, cout_p - Cout), (0, cin_p - Cin), (0, 0), (0, 0)))
    # (o, c, kh, kw) -> (o, c, dh, rp, kw) with kh = 2*dh + rp
    w5 = w.reshape(cout_p, cin_p, 2, 2, K_SIZE)
    if split_dh:
        wf = jnp.transpose(w5, (2, 0, 3, 4, 1)).reshape(2, cout_p, 8 * cin_p)
    else:
        wf = jnp.transpose(w5, (0, 2, 3, 4, 1)).reshape(cout_p, 16 * cin_p)
    return wf.astype(jnp.bfloat16)


def _instnorm_relu_store(acc, o_ref):
    """InstanceNorm2d(affine=False) + ReLU on a resident (CT, HW) f32 tile.

    Single-pass stats: one elementwise square + two lane (XLU) reductions,
    then centered/scale/ReLU fused into the store.  Padded Cout rows give
    mean = var = 0 -> output 0 and are sliced off by the wrapper.
    """
    inv_n = 1.0 / acc.shape[-1]
    mean = jnp.sum(acc, axis=-1, keepdims=True) * inv_n
    ex2 = jnp.sum(acc * acc, axis=-1, keepdims=True) * inv_n
    var = jnp.maximum(ex2 - mean * mean, 0.0)
    scale = jax.lax.rsqrt(var + EPS)
    y = (acc - mean) * scale
    # TODO(synk): Dropout(0.5) is identity in eval mode; training-mode torch
    # RNG dropout is not implemented.
    o_ref[0] = jnp.maximum(y, 0.0).astype(o_ref.dtype)


def _convblock_kernel_fused(ph_ref, w_ref, o_ref):
    """Duplicated-tap path: one MXU matmul with K = 16*cin_p.

    ph_ref: (1, 16*cin_p, HW) bf16, w_ref: (CT, 16*cin_p) bf16,
    o_ref : (1, CT, HW) f32.
    """
    acc = jnp.dot(w_ref[...], ph_ref[0], preferred_element_type=jnp.float32)
    _instnorm_relu_store(acc, o_ref)


def _convblock_kernel_sliced(ph_ref, w_ref, o_ref, *, Wo, HW):
    """Lane-aligned path (Wo % 128 == 0): two matmuls with K = 8*cin_p.

    ph_ref: (1, 8*cin_p, (Ho+1)*Wo) bf16, w_ref: (2, CT, 8*cin_p) bf16,
    o_ref : (1, CT, HW) f32.  The dh lane windows start at 0 and Wo, both
    static 128-multiples, so the ref slices load aligned (no relayout).
    """
    acc = jnp.dot(w_ref[0], ph_ref[0, :, :HW],
                  preferred_element_type=jnp.float32)
    acc = acc + jnp.dot(w_ref[1], ph_ref[0, :, Wo:Wo + HW],
                        preferred_element_type=jnp.float32)
    _instnorm_relu_store(acc, o_ref)


def conv_block_forward(x, weight):
    """x: (N, Cin, H, W) f32, weight: (Cout, Cin, 4, 4) f32 -> (N, Cout, H/2, W/2) f32."""
    N, Cin, H, W = x.shape
    Cout = weight.shape[0]
    assert weight.shape == (Cout, Cin, K_SIZE, K_SIZE)
    assert H % 2 == 0 and W % 2 == 0, "k=4, s=2, p=1 path expects even H, W"
    Ho, Wo = H // 2, W // 2
    HW = Ho * Wo

    cin_p = _round_up(Cin, 16)   # bf16 packs 16 sublanes/vreg -> K = 8*cin_p >= 128
    cout_p = _round_up(Cout, 8)

    # Cout tile: 128 saturates the v5e MXU and bounds per-step VMEM.
    # (v6e could take ct=256 for its 256x256 MXU at the cost of 2x out-block VMEM.)
    ct = 128 if cout_p % 128 == 0 else cout_p
    # v7x has 2 TensorCores: keep >= 2 parallel grid units when splittable.
    if N * (cout_p // ct) < 2 and ct >= 32 and ct % 16 == 0:
        ct //= 2
    n_ct = cout_p // ct

    phases8 = _make_phase_taps(x, cin_p, Ho, Wo)     # (N, 8*cin_p, (Ho+1)*Wo) bf16
    aligned = (Wo % 128 == 0)

    if aligned:
        # ~1x raw-input slab; kernel slices lanes at 0 / Wo (both 128-aligned).
        ph = phases8
        sp = (Ho + 1) * Wo
        w_f = _fuse_weights(weight, cout_p, cin_p, split_dh=True)   # (2, cout_p, 8*cin_p)
        in_specs = [
            pl.BlockSpec((1, 8 * cin_p, sp), lambda n, c: (n, 0, 0)),
            pl.BlockSpec((2, ct, 8 * cin_p), lambda n, c: (0, c, 0)),
        ]
        kernel = functools.partial(_convblock_kernel_sliced, Wo=Wo, HW=HW)
    else:
        # Duplicate the dh=0 / dh=1 lane windows host-side (2x slab bytes) so
        # every in-kernel access is lane-aligned and the conv is one matmul.
        ph = jnp.concatenate([phases8[:, :, :HW], phases8[:, :, Wo:Wo + HW]],
                             axis=1)                                # (N, 16*cin_p, HW)
        w_f = _fuse_weights(weight, cout_p, cin_p, split_dh=False)  # (cout_p, 16*cin_p)
        in_specs = [
            pl.BlockSpec((1, 16 * cin_p, HW), lambda n, c: (n, 0, 0)),
            pl.BlockSpec((ct, 16 * cin_p), lambda n, c: (c, 0)),
        ]
        kernel = _convblock_kernel_fused

    flops = 2 * N * cout_p * (16 * cin_p) * HW
    bytes_accessed = (ph.size * ph.dtype.itemsize
                      + w_f.size * w_f.dtype.itemsize
                      + N * cout_p * HW * 4)
    cost = pl.CostEstimate(flops=flops, transcendentals=N * cout_p,
                           bytes_accessed=bytes_accessed)

    out = pl.pallas_call(
        kernel,
        out_shape=jax.ShapeDtypeStruct((N, cout_p, HW), jnp.float32),
        grid_spec=pl.GridSpec(
            grid=(N, n_ct),
            in_specs=in_specs,
            out_specs=pl.BlockSpec((1, ct, HW), lambda n, c: (n, c, 0)),
        ),
        compiler_params=pltpu.CompilerParams(
            dimension_semantics=("parallel", "parallel"),
            # 48 MiB: leaves double-buffer headroom on v7x (64 MiB/TC total);
            # v5e/v6e (128 MiB) could go higher for larger blocks.
            vmem_limit_bytes=48 * 1024 * 1024,
        ),
        cost_estimate=cost,
    )(ph, w_f)

    # Lane dim is already the flattened NCHW spatial axis -> free reshape,
    # no transpose.  Channel slice is a no-op when Cout is a multiple of 8.
    return out[:, :Cout, :].reshape(N, Cout, Ho, Wo)


def _reference(x, weight):
    """Pure-JAX reference of the same forward (conv -> instancenorm -> relu)."""
    y = jax.lax.conv_general_dilated(
        x, weight, window_strides=(STRIDE, STRIDE),
        padding=((PAD, PAD), (PAD, PAD)),
        dimension_numbers=("NCHW", "OIHW", "NCHW"))
    mean = jnp.mean(y, axis=(2, 3), keepdims=True)
    var = jnp.mean((y - mean) ** 2, axis=(2, 3), keepdims=True)
    y = (y - mean) * jax.lax.rsqrt(var + EPS)
    return jnp.maximum(y, 0.0)


if __name__ == "__main__":
    key = jax.random.PRNGKey(0)
    kx, kw, kx2, kw2 = jax.random.split(key, 4)

    # Small-shape check (Wo = 8 -> duplicated-tap single-matmul path).
    N, Cin, H, W = 2, 4, 16, 16
    Cout = 8
    x = jax.random.normal(kx, (N, Cin, H, W), dtype=jnp.float32)
    weight = 0.1 * jax.random.normal(kw, (Cout, Cin, K_SIZE, K_SIZE), dtype=jnp.float32)

    out = jax.block_until_ready(conv_block_forward(x, weight))
    ref = _reference(x, weight)
    assert out.shape == (N, Cout, H // 2, W // 2)
    # bf16 matmul operands + single-pass variance -> loosened tolerance.
    assert jnp.allclose(out, ref, rtol=5e-2, atol=5e-2), float(jnp.max(jnp.abs(out - ref)))

    # Lane-aligned check (Wo = 128 -> two fused matmuls with ref lane slices).
    N2, Cin2, H2, W2, Cout2 = 1, 3, 256, 256, 8
    x2 = jax.random.normal(kx2, (N2, Cin2, H2, W2), dtype=jnp.float32)
    weight2 = 0.1 * jax.random.normal(kw2, (Cout2, Cin2, K_SIZE, K_SIZE), dtype=jnp.float32)

    out2 = jax.block_until_ready(conv_block_forward(x2, weight2))
    ref2 = _reference(x2, weight2)
    assert out2.shape == (N2, Cout2, H2 // 2, W2 // 2)
    assert jnp.allclose(out2, ref2, rtol=5e-2, atol=5e-2), float(jnp.max(jnp.abs(out2 - ref2)))

    print("KERNEL_OK")
</pallas_src>

<mosaic_0001>
module attributes {stable_mosaic.version = 11 : i64} {
  func.func @_convblock_kernel_fused(%arg0: i32, %arg1: i32, %arg2: memref<1x256x64xbf16, #tpu.memory_space<vmem>>, %arg3: memref<8x256xbf16, #tpu.memory_space<vmem>>, %arg4: memref<1x8x64xf32, #tpu.memory_space<vmem>>) attributes {dimension_semantics = [#tpu.dimension_semantics<parallel>, #tpu.dimension_semantics<parallel>], iteration_bounds = array<i64: 2, 1>, scalar_prefetch = 0 : i64, scratch_operands = 0 : i64, tpu.core_type = #tpu.core_type<tc>, window_params = [{transform_indices = @transform_0, window_bounds = array<i64: 1, 256, 64>}, {transform_indices = @transform_1, window_bounds = array<i64: 8, 256>}, {transform_indices = @transform_2, window_bounds = array<i64: 1, 8, 64>}]} {
    %c0 = arith.constant 0 : index
    %c0_0 = arith.constant 0 : index
    %0 = vector.load %arg3[%c0, %c0_0] : memref<8x256xbf16, #tpu.memory_space<vmem>>, vector<8x256xbf16>
    %c0_1 = arith.constant 0 : index
    %c0_2 = arith.constant 0 : index
    %c0_3 = arith.constant 0 : index
    %1 = vector.load %arg2[%c0_1, %c0_2, %c0_3] : memref<1x256x64xbf16, #tpu.memory_space<vmem>>, vector<1x256x64xbf16>
    %2 = vector.shape_cast %1 : vector<1x256x64xbf16> to vector<256x64xbf16>
    %cst = arith.constant dense<0.000000e+00> : vector<8x64xf32>
    %3 = tpu.matmul %0, %2, %cst {dimension_numbers = #tpu.dot_dimension_numbers<[1], [0], [0], [1], [0, 0, 1, 1], [], []>} : vector<8x256xbf16>, vector<256x64xbf16>, vector<8x64xf32> -> vector<8x64xf32>
    %cst_4 = arith.constant dense<0.000000e+00> : vector<8xf32>
    %4 = vector.multi_reduction <add>, %3, %cst_4 [1] : vector<8x64xf32> to vector<8xf32>
    %5 = vector.shape_cast %4 : vector<8xf32> to vector<8x1xf32>
    %cst_5 = arith.constant 1.562500e-02 : f32
    %6 = vector.broadcast %cst_5 : f32 to vector<8x1xf32>
    %7 = arith.mulf %5, %6 : vector<8x1xf32>
    %8 = arith.mulf %3, %3 : vector<8x64xf32>
    %cst_6 = arith.constant dense<0.000000e+00> : vector<8xf32>
    %9 = vector.multi_reduction <add>, %8, %cst_6 [1] : vector<8x64xf32> to vector<8xf32>
    %10 = vector.shape_cast %9 : vector<8xf32> to vector<8x1xf32>
    %cst_7 = arith.constant 1.562500e-02 : f32
    %11 = vector.broadcast %cst_7 : f32 to vector<8x1xf32>
    %12 = arith.mulf %10, %11 : vector<8x1xf32>
    %13 = arith.mulf %7, %7 : vector<8x1xf32>
    %14 = arith.subf %12, %13 : vector<8x1xf32>
    %cst_8 = arith.constant 0.000000e+00 : f32
    %15 = vector.broadcast %cst_8 : f32 to vector<8x1xf32>
    %16 = arith.maximumf %14, %15 : vector<8x1xf32>
    %cst_9 = arith.constant 9.99999974E-6 : f32
    %17 = vector.broadcast %cst_9 : f32 to vector<8x1xf32>
    %18 = arith.addf %16, %17 : vector<8x1xf32>
    %19 = math.rsqrt %18 : vector<8x1xf32>
    %20 = vector.broadcast %7 : vector<8x1xf32> to vector<8x64xf32>
    %21 = arith.subf %3, %20 : vector<8x64xf32>
    %22 = vector.broadcast %19 : vector<8x1xf32> to vector<8x64xf32>
    %23 = arith.mulf %21, %22 : vector<8x64xf32>
    %cst_10 = arith.constant 0.000000e+00 : f32
    %24 = vector.broadcast %cst_10 : f32 to vector<8x64xf32>
    %25 = arith.maximumf %23, %24 : vector<8x64xf32>
    %c0_11 = arith.constant 0 : index
    %c0_12 = arith.constant 0 : index
    %c0_13 = arith.constant 0 : index
    %26 = vector.load %arg4[%c0_11, %c0_12, %c0_13] : memref<1x8x64xf32, #tpu.memory_space<vmem>>, vector<1x8x64xf32>
    %27 = vector.shape_cast %26 : vector<1x8x64xf32> to vector<8x64xf32>
    %28 = vector.shape_cast %25 : vector<8x64xf32> to vector<1x8x64xf32>
    tpu.vector_store %arg4[%c0_11, %c0_12, %c0_13], %28 {strides = array<i32>} : memref<1x8x64xf32, #tpu.memory_space<vmem>>, vector<1x8x64xf32>,
    return
  }
  func.func @transform_0(%arg0: i32, %arg1: i32) -> (i32, i32, i32) {
    %c0_i32 = arith.constant 0 : i32
    %c0_i32_0 = arith.constant 0 : i32
    %c0_i32_1 = arith.constant 0 : i32
    return %arg0, %c0_i32, %c0_i32_0 : i32, i32, i32
  }
  func.func @transform_1(%arg0: i32, %arg1: i32) -> (i32, i32) {
    %c0_i32 = arith.constant 0 : i32
    %c0_i32_0 = arith.constant 0 : i32
    return %arg1, %c0_i32 : i32, i32
  }
  func.func @transform_2(%arg0: i32, %arg1: i32) -> (i32, i32, i32) {
    %c0_i32 = arith.constant 0 : i32
    %c0_i32_0 = arith.constant 0 : i32
    return %arg0, %arg1, %c0_i32 : i32, i32, i32
  }
}

</mosaic_0001>

<bundles_post_ra>
// kernel: tpu_custom_call.1
= control target key start
LH: loop header
LB: loop body
LE: loop exit
PB: predicated region body
PF: predicated region fallthrough
CT: control target
= control target key end

     0   :  { %7 = vsyncpa [#allocation3], 0  ;;  %s798_s0 = inlined_call_operand.vmem [shape: bf16[2,256,64], index: 0, kind: input, shape index: {}]   ;;  %s799_s1 = inlined_call_operand.vmem [shape: bf16[8,256], index: 1, kind: input, shape index: {}]   ;;  %s800_s2 = inlined_call_operand.hbm [shape: f32[2,8,64], index: 2, kind: output, shape index: {}]  }
   0x1   :  { %9 = vsyncpa [#allocation3 + $0x1], 0  ;;  %s693_s9 = smov 0   ;;  %s695_s10 = smov 0  }
   0x2   :  { %s697_s11 = smov 0   ;;  %s699_s12 = smov 0  }
   0x3   :  { %s701_s13 = smov 0   ;;  %s703_s14 = smov 0  }
   0x4 LB: > { %s470_s15 = sadd.s32 4294967295, %s675_s14   ;;  %s471_s16 = sadd.s32 4294967294, %s675_s14   ;;  %s675_s14 = sphi %s703_s14, %s15_s14   ;;  %s671_s13 = sphi %s701_s13, %s807_s13   ;;  %s667_s12 = sphi %s699_s12, %s806_s12   ;;  %s663_s11 = sphi %s697_s11, %s805_s11   ;;  %s659_s10 = sphi %s695_s10, %s804_s10   ;;  %s655_s9 = sphi %s693_s9, %s803_s9  }
   0x5   : > { %s27_s17 = sadd.s32 1, %s671_s13  ;;  %s88_s18 = sadd.s32 1, %s663_s11 }
   0x6   : > { %p29_p0 = scmp.ge.s32.totalorder %s27_s17, 2  ;;  %p98_p1 = scmp.ne.s32.totalorder %s663_s11, %s659_s10 }
   0x7   : > { %p99_p2 = scmp.eq.s32.totalorder %s470_s15, 1  ;;  %p104_p3 = scmp.ne.s32.totalorder %s659_s10, %s655_s9 }
   0x8   : > { %s809_s17 = smov (%p29_p0, %s27_s17), 0  ;;  %p105_p5 = scmp.eq.s32.totalorder %s471_s16, 1 }
   0x9   : > { %p733_p4 = por %p99_p2, %p98_p1  ;;  %s83_s20 = ssub.s32 %s671_s13, %s809_s17 }
   0xa   : > { %p475_p6 = scmp.ge.s32.totalorder %s675_s14, 1  ;;  %p86_p7 = scmp.eq.s32.totalorder %s83_s20, 0 }
   0xb   : > { %p740_p8 = por %p105_p5, %p104_p3  ;;  %p139_p9 = scmp.lt.s32.totalorder %s675_s14, 3 }
   0xc   : > { %s746_s22 = scalar_select %p86_p7, %s663_s11, %s88_s18  }
   0xd   : > { %p140_p10 = pnand %p475_p6, %p139_p9 }
   0xe   : > { %p166_p11 = scmp.lt.s32.totalorder (!%p140_p10), %s667_s12, 1  ;;  %s163_s30 = sand.u32 (!%p140_p10), 1, %s659_s10  }
   0xf   : > { %143 = sbr.rel (%p140_p10) target bundleno = 436 (0x1b4), region = 28  ;;  %s476_s3 = sshll.u32 (!%p140_p10), %s163_s30, 3 }
  0x10   : > { %s498_s4 = sshll.u32 (!%p140_p10), %s667_s12, 7  ;;  %s165_s5 = scalar_lea.vmem (!%p140_p10), [#allocation2], %s476_s3 }
  0x11   : > { %s387_s6 = sshll.u32 (!%p140_p10), %s165_s5, 4  ;;  %s385_s15 = scalar_lea.hbm (!%p140_p10), %s800_s2, %s498_s4  ;;  %s388_s6 = int_to_ptr.vmem [resolvable:$true] %s387_s6 }
  0x12   : > { %s373_s16 = scalar_lea.sflag (!%p140_p10), [#allocation3], %s163_s30  ;;  %s599_s18 = scalar_lea.vmem (!%p140_p10), %s388_s6, 128 }
  0x13   : > { %p600_p12 = scmp.ne.s32.totalorder (!%p140_p10), %s388_s6, %s599_s18  ;;  %s677_s20 = smov (!%p140_p10), [#allocation2]  }
  0x14   : > { %v177_v0 = vld [vmem:[%s799_s1] sm:$0xff]  ;;  %s167_s25 = scalar_select %p166_p11, %s667_s12, 1  ;;  %vm353_vm0 = vcmask 523264  }
  0x15   : > { %v480_v1 = vcombine.high %v177_v0, %v177_v0  ;;  %v479_v18 = vcombine.low %v177_v0, %v177_v0  ;;  %p601_p13 = pnand %p600_p12, %p733_p4  ;;  %s603_s23 = sshll.u32 %s677_s20, 4  ;;  %s604_s23 = int_to_ptr.vmem [resolvable:$false] %s603_s23 }
  0x16   : > { %s501_s26 = sshll.u32 %s167_s25, 7  ;;  %s605_s12 = scalar_lea.vmem %s604_s23, 256 }
  0x17   : > { %345 = vmatprep.mubr.bf16.mxu0 %v480_v1  ;;  %s170_s29 = scalar_lea.vmem %s798_s0, %s501_s26  ;;  %p602_p0 = pneg %p601_p13 }
  0x18   : > { %v579_v2 = vld [vmem:[%s170_s29 + $0x78] sm:$0xff]   ;;  %v581_v4 = vld [vmem:[%s170_s29 + $0x70] sm:$0xff]   ;;  %v583_v6 = vld [vmem:[%s170_s29 + $0x68] sm:$0xff]   ;;  %p606_p1 = scmp.lt.s32.totalorder %s388_s6, %s604_s23  ;;  %p607_p2 = scmp.lt.s32.totalorder %s605_s12, %s599_s18 }
  0x19   : > { %v580_v3 = vld [vmem:[%s170_s29 + $0x38] sm:$0xff]   ;;  %502 = vmatprep.subr.bf16.mxu0 %v579_v2  ;;  %v582_v5 = vld [vmem:[%s170_s29 + $0x30] sm:$0xff]   ;;  %v584_v7 = vld [vmem:[%s170_s29 + $0x28] sm:$0xff]  }
  0x1a   : > { %503 = vmatpush3.bf16.msra.mxu0 %v580_v3  ;;  %v585_v8 = vld [vmem:[%s170_s29 + $0x60] sm:$0xff]   ;;  %v587_v10 = vld [vmem:[%s170_s29 + $0x58] sm:$0xff]   ;;  %v589_v12 = vld [vmem:[%s170_s29 + $0x50] sm:$0xff]   ;;  %p608_p3 = por %p607_p2, %p606_p1 }
  0x1b   : > { %504 = vmatprep.subr.bf16.mxu0 %v581_v4  ;;  %v586_v9 = vld [vmem:[%s170_s29 + $0x20] sm:$0xff]   ;;  %v588_v11 = vld [vmem:[%s170_s29 + $0x18] sm:$0xff]   ;;  %v590_v13 = vld [vmem:[%s170_s29 + $0x10] sm:$0xff]  }
  0x1c   : > { %v591_v14 = vld [vmem:[%s170_s29 + $0x48] sm:$0xff]   ;;  %v593_v16 = vld [vmem:[%s170_s29 + $0x40] sm:$0xff]   ;;  %p609_p5 = pnand %p608_p3, %p602_p0 }
  0x1d   : > { %v592_v15 = vld [vmem:[%s170_s29 + $0x8] sm:$0xff]   ;;  %v594_v17 = vld [vmem:[%s170_s29] sm:$0xff]  }
  0x1e   : > { %505 = vmatpush3.bf16.msra.mxu0 %v582_v5 }
  0x1f   : > { %506 = vmatprep.subr.bf16.mxu0 %v583_v6 }
  0x22   : > { %507 = vmatpush3.bf16.msra.mxu0 %v584_v7 }
  0x23   : > { %508 = vmatprep.subr.bf16.mxu0 %v585_v8 }
  0x26   : > { %509 = vmatpush3.bf16.msra.mxu0 %v586_v9 }
  0x27   : > { %510 = vmatprep.subr.bf16.mxu0 %v587_v10 }
  0x2a   : > { %511 = vmatpush3.bf16.msra.mxu0 %v588_v11 }
  0x2b   : > { %512 = vmatprep.subr.bf16.mxu0 %v589_v12 }
  0x2e   : > { %513 = vmatpush3.bf16.msra.mxu0 %v590_v13 }
  0x2f   : > { %514 = vmatprep.subr.bf16.mxu0 %v591_v14 }
  0x32   : > { %515 = vmatpush3.bf16.msra.mxu0 %v592_v15 }
  0x33   : > { %516 = vmatprep.subr.bf16.mxu0 %v593_v16 }
  0x36   : > { %517 = vmatpush3.bf16.msra.mxu0 %v594_v17 }
  0x39   : > { %346 = vmatmul.mubr.bf16.vlgmr.msra.gmra.mxu0 %v479_v18 }
  0xf9   : > { %v518_v19 = vpop.f32.mrf.mxu0 }
  0xfb   : > { %v519_v20 = vpop.f32.mrf.mxu0 }
  0xfc   : > { %v520_v21 = vadd.f32 %v519_v20, %v518_v19 }
  0xfd   : > { %v521_v22 = vpop.f32.mrf.mxu0 }
  0xfe   : > { %v354_v23 = vsel %vm353_vm0, %v520_v21, 0.0  ;;  %v358_v24 = vmul.f32 %v520_v21, %v520_v21 }
  0xff   : > { %v522_v25 = vpop.f32.mrf.mxu0  ;;  %355 = vadd.xlane.f32.xlu0 %v354_v23 }
 0x100   : > { %v359_v26 = vsel %vm353_vm0, %v358_v24, 0.0 }
 0x103   : > { %360 = vadd.xlane.f32.xlu0 %v359_v26 }
 0x188   : > { %v356_v27 = vpop.xlane.xlu0 %355 }
 0x189   : > { %v357_v28 = vmul.f32 0.015625, %v356_v27 }
 0x18b   : > { %v363_v30 = vmul.f32 %v357_v28, %v357_v28  ;;  %v368_v35 = vsub.f32 %v520_v21, %v357_v28 }
 0x18c   : > { %v361_v29 = vpop.xlane.xlu0 %360 }
 0x18d   : > { %v362_v31 = vmul.f32 0.015625, %v361_v29 }
 0x18f   : > { %v364_v32 = vsub.f32 %v362_v31, %v363_v30 }
 0x191   : > { %v365_v33 = vmax.f32 %v364_v32, 0.0 }
 0x193   : > { %v366_v34 = vadd.f32 1e-05, %v365_v33 }
 0x195   : > { %597 = vrsqrt.f32 %v366_v34 }
 0x1a2   : > { %v598_v36 = vpop.eup %597 }
 0x1a3   : > { %v369_v37 = vmul.f32 %v598_v36, %v368_v35 }
 0x1a5   : > { %v370_v38 = vmax.f32 %v369_v37, 0.0 }
 0x1a7   : > { %371 = vst.msk [vmem:[%s165_s5] sm:$0xff] %vm353_vm0, %v370_v38 }
 0x1a8   : > { %612 = shalt.err (!%p609_p5)
}
 0x1a9   : > { %s613_s24 = scalar_lea.hbm %s385_s15, 128  ;;  %s617_s27 = scalar_lea.hbm %s800_s2, 256 }
 0x1aa   : > { %p614_p6 = scmp.ne.s32.totalorder %s385_s15, %s613_s24  ;;  %p618_p10 = scmp.lt.s32.totalorder %s385_s15, %s800_s2 }
 0x1ab   : > { %p619_p11 = scmp.lt.s32.totalorder %s617_s27, %s613_s24 }
 0x1ac   : > { %p615_p7 = pnand %p614_p6, %p733_p4 }
 0x1ad   : > { %p620_p12 = por %p619_p11, %p618_p10 }
 0x1ae   : > { %p616_p9 = pneg %p615_p7 }
 0x1b0   : > { %p621_p13 = pnand %p620_p12, %p616_p9 }
 0x1b2   : > { %624 = shalt.err (!%p621_p13)
}
 0x1b3   : > { %524 = dma.vmem_to_hbm [thread:$0]  (%p733_p4), %s388_s6, 128, %s385_s15, %s373_s16  }
 0x1b4 PF: > { %p530_p0 = scmp.ge.s32.totalorder %s675_s14, 2  ;;  %s399_s30 = sand.u32 1, %s655_s9  }
 0x1b5   : > { %s400_s3 = scalar_lea.sflag [#allocation3], %s399_s30 }
 0x1b6   : > { %p527_p1 = pnand %p530_p0, %p740_p8 }
 0x1b8   : > { %p528_p2 = pneg %p527_p1 }
 0x1ba   : > { %650 = dma.done.wait (%p528_p2), %s400_s3, 128  }
 0x1bb   : > { %652 = vsyncadd (%p528_p2), %s400_s3, 4294967168  ;;  %s15_s14 = sadd.s32 1, %s675_s14   ;;  %s803_s9 = smov %s659_s10 }
 0x1bc   : > { %p12_p3 = scmp.ge.s32.totalorder %s15_s14, 4   ;;  %s804_s10 = smov %s663_s11 }
 0x1bd   : > { %s805_s11 = smov %s746_s22  ;;  %s806_s12 = smov %s671_s13 }
 0x1be   : > { %s807_s13 = smov %s809_s17  ;;  %14 = sbr.rel (!%p12_p3) target bundleno = 4 (0x4), region = 66 }
 0x1c3   :  { %405 = vsyncpa [#allocation3], 1 }
 0x1c4   :  { %407 = vsyncpa [#allocation3 + $0x1], 1 }

</bundles_post_ra>
